<compile_context>
chip_gen: v5e
topology: v5e:2x2
jax: 0.10.0
libtpu: 0.0.40
codegen_flags: <defaults>
</compile_context>

<pallas_src>
import math
from functools import partial

import jax
import jax.numpy as jnp
from jax.experimental import pallas as pl
from jax.experimental.pallas import tpu as pltpu


# --------------------------------------------------------------------------- #
# Kernels
# --------------------------------------------------------------------------- #

def _gelu_tanh(x):
    # GELU(approximate='tanh'); argument factored to trim VALU multiplies.
    c = math.sqrt(2.0 / math.pi)
    return 0.5 * x * (1.0 + jnp.tanh(x * (c + (c * 0.044715) * (x * x))))


def ffn_fused_kernel(x_ref, w1_ref, b1_ref, w2_ref, b2_ref, o_ref):
    """Weights-resident path: grid = (M_pad // tm,), W1/W2/b1/b2 grid-invariant.

    x_ref: (tm, D) bf16   w1_ref: (D, H) bf16   b1_ref: (1, H) f32
    w2_ref: (H, D) bf16   b2_ref: (1, D) f32    o_ref:  (tm, D) out dtype
    """
    # MXU on native (bf16) operands, f32 accumulation.
    h = jnp.dot(x_ref[...], w1_ref[...], preferred_element_type=jnp.float32)
    # Bias + tanh-GELU in f32 (VPU/EUP work hidden under the MXU).
    h = _gelu_tanh(h + b1_ref[...])
    # TODO(synk): Dropout(p=0.1) layers are identity at inference; training-mode
    # stochastic masking (pltpu.prng_random_bits) intentionally omitted.
    y = jnp.dot(h.astype(w2_ref.dtype), w2_ref[...],
                preferred_element_type=jnp.float32)
    o_ref[...] = (y + b2_ref[...]).astype(o_ref.dtype)


def ffn_tiled_kernel(x_ref, w1_ref, b1_ref, w2_ref, b2_ref, o_ref, acc_ref):
    """Hidden-tiled fallback: grid = (M_pad // tm, H_pad // th), k last & arbitrary.

    x_ref: (tm, D)    w1_ref: (D, th)   b1_ref: (1, th) f32
    w2_ref: (th, D)   b2_ref: (1, D) f32   acc_ref: (tm, D) f32 scratch
    """
    k = pl.program_id(1)

    @pl.when(k == 0)
    def _():
        acc_ref[...] = jnp.zeros_like(acc_ref)

    h = jnp.dot(x_ref[...], w1_ref[...], preferred_element_type=jnp.float32)
    h = _gelu_tanh(h + b1_ref[...])
    acc_ref[...] += jnp.dot(h.astype(w2_ref.dtype), w2_ref[...],
                            preferred_element_type=jnp.float32)

    @pl.when(k == pl.num_programs(1) - 1)
    def _():
        o_ref[...] = (acc_ref[...] + b2_ref[...]).astype(o_ref.dtype)


# --------------------------------------------------------------------------- #
# Host-side planning helpers
# --------------------------------------------------------------------------- #

def _round_up(x, m):
    return (x + m - 1) // m * m


def _vmem_capacity_bytes():
    try:
        return int(pltpu.get_tpu_info().vmem_capacity_bytes)
    except Exception:
        return 64 * 1024 * 1024  # conservative (v7x-sized) fallback


def _pick_tm(M, tm_max=256):
    """Row tile: multiple of 16, bounded padding, >=2 tiles when M allows (megacore)."""
    tm_cap = min(tm_max, _round_up(M, 16))
    if M >= 32:  # leave at least two row tiles so v7x's 2nd TensorCore isn't idle
        tm_cap = min(tm_cap, _round_up((M + 1) // 2, 16))
    best = 16
    cand = 16
    while cand <= tm_cap:
        pad = _round_up(M, cand) - M
        if 4 * pad <= max(M, 1):  # <= 25% padded rows
            best = cand
        cand += 16
    return best


# --------------------------------------------------------------------------- #
# Wrapper
# --------------------------------------------------------------------------- #

@partial(jax.jit,
         static_argnames=("tm", "th", "use_fused", "vmem_limit", "compute_dtype"))
def _ffn_impl(x, w1, b1, w2, b2, *, tm, th, use_fused, vmem_limit, compute_dtype):
    B, T, D = x.shape
    H = w1.shape[1]
    M = B * T
    M_pad = _round_up(M, tm)

    # bf16 MXU operands (halves HBM/VMEM traffic); biases stay f32.
    x2 = x.reshape(M, D).astype(compute_dtype)
    if M_pad != M:
        x2 = jnp.pad(x2, ((0, M_pad - M), (0, 0)))
    w1c = w1.astype(compute_dtype)
    w2c = w2.astype(compute_dtype)
    b1_2 = b1.reshape(1, H).astype(jnp.float32)
    b2_2 = b2.reshape(1, D).astype(jnp.float32)

    if use_fused:
        out = pl.pallas_call(
            ffn_fused_kernel,
            out_shape=jax.ShapeDtypeStruct((M_pad, D), x.dtype),
            grid_spec=pltpu.PrefetchScalarGridSpec(
                num_scalar_prefetch=0,
                grid=(M_pad // tm,),
                in_specs=[
                    pl.BlockSpec((tm, D), lambda i: (i, 0)),   # x row tile
                    pl.BlockSpec((D, H), lambda i: (0, 0)),    # W1 (resident)
                    pl.BlockSpec((1, H), lambda i: (0, 0)),    # b1 (resident)
                    pl.BlockSpec((H, D), lambda i: (0, 0)),    # W2 (resident)
                    pl.BlockSpec((1, D), lambda i: (0, 0)),    # b2 (resident)
                ],
                out_specs=pl.BlockSpec((tm, D), lambda i: (i, 0)),
            ),
            compiler_params=pltpu.CompilerParams(
                dimension_semantics=("parallel",),
                vmem_limit_bytes=vmem_limit),
        )(x2, w1c, b1_2, w2c, b2_2)
    else:
        # Hidden dim tiled; pad H to a multiple of 128 if needed (exact: the
        # padded columns produce gelu(0)=0 and the padded W2 rows contribute 0).
        H_pad = _round_up(H, 128)
        if H_pad != H:
            w1c = jnp.pad(w1c, ((0, 0), (0, H_pad - H)))
            b1_2 = jnp.pad(b1_2, ((0, 0), (0, H_pad - H)))
            w2c = jnp.pad(w2c, ((0, H_pad - H), (0, 0)))
        out = pl.pallas_call(
            ffn_tiled_kernel,
            out_shape=jax.ShapeDtypeStruct((M_pad, D), x.dtype),
            grid_spec=pltpu.PrefetchScalarGridSpec(
                num_scalar_prefetch=0,
                grid=(M_pad // tm, H_pad // th),
                in_specs=[
                    pl.BlockSpec((tm, D), lambda i, k: (i, 0)),   # x row tile
                    pl.BlockSpec((D, th), lambda i, k: (0, k)),   # W1 column slab
                    pl.BlockSpec((1, th), lambda i, k: (0, k)),   # b1 slab
                    pl.BlockSpec((th, D), lambda i, k: (k, 0)),   # W2 row slab
                    pl.BlockSpec((1, D), lambda i, k: (0, 0)),    # b2
                ],
                out_specs=pl.BlockSpec((tm, D), lambda i, k: (i, 0)),
                scratch_shapes=[pltpu.VMEM((tm, D), jnp.float32)],
            ),
            compiler_params=pltpu.CompilerParams(
                dimension_semantics=("parallel", "arbitrary"),
                vmem_limit_bytes=vmem_limit),
        )(x2, w1c, b1_2, w2c, b2_2)

    if M_pad != M:
        out = out[:M]
    return out.reshape(B, T, D)


def feed_forward(x, w1, b1, w2, b2, *, compute_dtype=jnp.bfloat16,
                 tm_max=256, th_max=None, force_tiled=False):
    """y = gelu_tanh(x @ W1 + b1) @ W2 + b2.   x: [B, T, D] -> [B, T, D]."""
    B, T, D = x.shape
    H = w1.shape[1]
    M = B * T

    tm = _pick_tm(M, tm_max)

    act_b = jnp.dtype(compute_dtype).itemsize
    out_b = jnp.dtype(x.dtype).itemsize

    cap = _vmem_capacity_bytes()
    usable = int(cap * 0.85)  # ~54 MiB on v7x, ~108 MiB on v5e/v6e

    def _bytes(th, with_acc):
        b = (2 * tm * D * act_b            # x row tile (double-buffered)
             + 2 * tm * D * out_b          # output tile (double-buffered)
             + 2 * D * th * act_b          # W1 slab (double-buffered bound)
             + 2 * th * D * act_b          # W2 slab
             + 2 * (th + D) * 4            # biases (f32)
             + 6 * tm * th                 # f32 GELU intermediate + bf16 copy
             + 2 * tm * D * 4)             # f32 second-matmul result + margin
        if with_acc:
            b += tm * D * 4                # f32 accumulator scratch
        return b

    use_fused = ((not force_tiled) and (th_max is None)
                 and _bytes(H, False) <= usable)

    if use_fused:
        th = H
        vmem_limit = int(min(cap, max(usable, _bytes(H, False))))
    else:
        H_pad = _round_up(H, 128)
        th_cap = H_pad if th_max is None else min(H_pad, _round_up(th_max, 128))
        th = 128
        d = 128
        while d <= th_cap:
            if H_pad % d == 0 and _bytes(d, True) <= usable:
                th = d
            d += 128
        vmem_limit = int(min(cap, max(usable, _bytes(th, True))))

    return _ffn_impl(x, w1, b1, w2, b2, tm=tm, th=th, use_fused=use_fused,
                     vmem_limit=vmem_limit, compute_dtype=compute_dtype)


# --------------------------------------------------------------------------- #
# Reference + test
# --------------------------------------------------------------------------- #

def reference(x, w1, b1, w2, b2):
    h = _gelu_tanh(jnp.einsum("btd,dh->bth", x, w1,
                              preferred_element_type=jnp.float32) + b1)
    return jnp.einsum("bth,hd->btd", h, w2,
                      preferred_element_type=jnp.float32) + b2


if __name__ == "__main__":
    # Small shapes consistent with the module: emb_dim scaled down from 768 to
    # 128 (lane-dense 128-wide tiles), hidden = 4 * emb_dim.
    B, T, D = 2, 64, 128
    H = 4 * D

    key = jax.random.PRNGKey(0)
    kx, k1, k2, k3, k4 = jax.random.split(key, 5)

    x = jax.random.normal(kx, (B, T, D), dtype=jnp.float32)
    # Weights stored [in, out] (transposed vs torch) for row-major MXU matmuls.
    w1 = jax.random.normal(k1, (D, H), dtype=jnp.float32) * 0.02
    b1 = jax.random.normal(k2, (H,), dtype=jnp.float32) * 0.02
    w2 = jax.random.normal(k3, (H, D), dtype=jnp.float32) * 0.02
    b2 = jax.random.normal(k4, (D,), dtype=jnp.float32) * 0.02

    # Reference with bf16-rounded MXU operands (kernel uses bf16 inputs with
    # f32 accumulation; remaining diff is only the bf16 cast of the GELU output).
    def bf16_round(a):
        return a.astype(jnp.bfloat16).astype(jnp.float32)

    y_ref = reference(bf16_round(x), bf16_round(w1), b1, bf16_round(w2), b2)

    # Fast path: weights resident in VMEM, no hidden-dim tiling.
    y_fused = jax.block_until_ready(feed_forward(x, w1, b1, w2, b2))
    assert y_fused.shape == (B, T, D)
    assert jnp.allclose(y_fused, y_ref, atol=1e-2, rtol=1e-2), \
        "fused kernel mismatch vs reference"

    # Fallback path: hidden dim tiled (th=128 -> 4 reduction steps) with the
    # f32 VMEM accumulator; exercises the pl.when init/finalize logic.
    y_tiled = jax.block_until_ready(
        feed_forward(x, w1, b1, w2, b2, force_tiled=True, th_max=128))
    assert jnp.allclose(y_tiled, y_ref, atol=1e-2, rtol=1e-2), \
        "tiled kernel mismatch vs reference"
    assert jnp.allclose(y_tiled, y_fused, atol=1e-2, rtol=1e-2), \
        "tiled vs fused mismatch"

    print("KERNEL_OK")
</pallas_src>

<mosaic_0001>
module attributes {stable_mosaic.version = 11 : i64} {
  func.func @ffn_fused_kernel(%arg0: i32, %arg1: memref<64x128xbf16, #tpu.memory_space<vmem>>, %arg2: memref<128x512xbf16, #tpu.memory_space<vmem>>, %arg3: memref<1x512xf32, #tpu.memory_space<vmem>>, %arg4: memref<512x128xbf16, #tpu.memory_space<vmem>>, %arg5: memref<1x128xf32, #tpu.memory_space<vmem>>, %arg6: memref<64x128xf32, #tpu.memory_space<vmem>>) attributes {dimension_semantics = [#tpu.dimension_semantics<parallel>], iteration_bounds = array<i64: 2>, scalar_prefetch = 0 : i64, scratch_operands = 0 : i64, tpu.core_type = #tpu.core_type<tc>, window_params = [{transform_indices = @transform_0, window_bounds = array<i64: 64, 128>}, {pipeline_mode = #tpu.pipeline_mode<synchronous>, transform_indices = @transform_1, window_bounds = array<i64: 128, 512>}, {pipeline_mode = #tpu.pipeline_mode<synchronous>, transform_indices = @transform_2, window_bounds = array<i64: 1, 512>}, {pipeline_mode = #tpu.pipeline_mode<synchronous>, transform_indices = @transform_3, window_bounds = array<i64: 512, 128>}, {pipeline_mode = #tpu.pipeline_mode<synchronous>, transform_indices = @transform_4, window_bounds = array<i64: 1, 128>}, {transform_indices = @transform_5, window_bounds = array<i64: 64, 128>}]} {
    %c0 = arith.constant 0 : index
    %c0_0 = arith.constant 0 : index
    %0 = vector.load %arg1[%c0, %c0_0] : memref<64x128xbf16, #tpu.memory_space<vmem>>, vector<64x128xbf16>
    %c0_1 = arith.constant 0 : index
    %c0_2 = arith.constant 0 : index
    %1 = vector.load %arg2[%c0_1, %c0_2] : memref<128x512xbf16, #tpu.memory_space<vmem>>, vector<128x512xbf16>
    %cst = arith.constant dense<0.000000e+00> : vector<64x512xf32>
    %2 = tpu.matmul %0, %1, %cst {dimension_numbers = #tpu.dot_dimension_numbers<[1], [0], [0], [1], [0, 0, 1, 1], [], []>} : vector<64x128xbf16>, vector<128x512xbf16>, vector<64x512xf32> -> vector<64x512xf32>
    %c0_3 = arith.constant 0 : index
    %c0_4 = arith.constant 0 : index
    %3 = vector.load %arg3[%c0_3, %c0_4] : memref<1x512xf32, #tpu.memory_space<vmem>>, vector<1x512xf32>
    %4 = vector.broadcast %3 : vector<1x512xf32> to vector<64x512xf32>
    %5 = arith.addf %2, %4 : vector<64x512xf32>
    %cst_5 = arith.constant 5.000000e-01 : f32
    %6 = vector.broadcast %cst_5 : f32 to vector<64x512xf32>
    %7 = arith.mulf %6, %5 : vector<64x512xf32>
    %8 = arith.mulf %5, %5 : vector<64x512xf32>
    %cst_6 = arith.constant 0.0356774069 : f32
    %9 = vector.broadcast %cst_6 : f32 to vector<64x512xf32>
    %10 = arith.mulf %9, %8 : vector<64x512xf32>
    %cst_7 = arith.constant 0.797884583 : f32
    %11 = vector.broadcast %cst_7 : f32 to vector<64x512xf32>
    %12 = arith.addf %11, %10 : vector<64x512xf32>
    %13 = arith.mulf %5, %12 : vector<64x512xf32>
    %14 = math.tanh %13 : vector<64x512xf32>
    %cst_8 = arith.constant 1.000000e+00 : f32
    %15 = vector.broadcast %cst_8 : f32 to vector<64x512xf32>
    %16 = arith.addf %15, %14 : vector<64x512xf32>
    %17 = arith.mulf %7, %16 : vector<64x512xf32>
    %18 = arith.truncf %17 : vector<64x512xf32> to vector<64x512xbf16>
    %c0_9 = arith.constant 0 : index
    %c0_10 = arith.constant 0 : index
    %19 = vector.load %arg4[%c0_9, %c0_10] : memref<512x128xbf16, #tpu.memory_space<vmem>>, vector<512x128xbf16>
    %cst_11 = arith.constant dense<0.000000e+00> : vector<64x128xf32>
    %20 = tpu.matmul %18, %19, %cst_11 {dimension_numbers = #tpu.dot_dimension_numbers<[1], [0], [0], [1], [0, 0, 1, 1], [], []>} : vector<64x512xbf16>, vector<512x128xbf16>, vector<64x128xf32> -> vector<64x128xf32>
    %c0_12 = arith.constant 0 : index
    %c0_13 = arith.constant 0 : index
    %21 = vector.load %arg5[%c0_12, %c0_13] : memref<1x128xf32, #tpu.memory_space<vmem>>, vector<1x128xf32>
    %22 = vector.broadcast %21 : vector<1x128xf32> to vector<64x128xf32>
    %23 = arith.addf %20, %22 : vector<64x128xf32>
    %c0_14 = arith.constant 0 : index
    %c0_15 = arith.constant 0 : index
    %24 = vector.load %arg6[%c0_14, %c0_15] : memref<64x128xf32, #tpu.memory_space<vmem>>, vector<64x128xf32>
    tpu.vector_store %arg6[%c0_14, %c0_15], %23 {strides = array<i32>} : memref<64x128xf32, #tpu.memory_space<vmem>>, vector<64x128xf32>,
    return
  }
  func.func @transform_0(%arg0: i32) -> (i32, i32) {
    %c0_i32 = arith.constant 0 : i32
    %c0_i32_0 = arith.constant 0 : i32
    return %arg0, %c0_i32 : i32, i32
  }
  func.func @transform_1(%arg0: i32) -> (i32, i32) {
    %c0_i32 = arith.constant 0 : i32
    %c0_i32_0 = arith.constant 0 : i32
    %c0_i32_1 = arith.constant 0 : i32
    return %c0_i32, %c0_i32_0 : i32, i32
  }
  func.func @transform_2(%arg0: i32) -> (i32, i32) {
    %c0_i32 = arith.constant 0 : i32
    %c0_i32_0 = arith.constant 0 : i32
    %c0_i32_1 = arith.constant 0 : i32
    return %c0_i32, %c0_i32_0 : i32, i32
  }
  func.func @transform_3(%arg0: i32) -> (i32, i32) {
    %c0_i32 = arith.constant 0 : i32
    %c0_i32_0 = arith.constant 0 : i32
    %c0_i32_1 = arith.constant 0 : i32
    return %c0_i32, %c0_i32_0 : i32, i32
  }
  func.func @transform_4(%arg0: i32) -> (i32, i32) {
    %c0_i32 = arith.constant 0 : i32
    %c0_i32_0 = arith.constant 0 : i32
    %c0_i32_1 = arith.constant 0 : i32
    return %c0_i32, %c0_i32_0 : i32, i32
  }
  func.func @transform_5(%arg0: i32) -> (i32, i32) {
    %c0_i32 = arith.constant 0 : i32
    %c0_i32_0 = arith.constant 0 : i32
    return %arg0, %c0_i32 : i32, i32
  }
}

</mosaic_0001>

<bundles_post_ra>
// kernel: _ffn_impl.1
= control target key start
LH: loop header
LB: loop body
LE: loop exit
PB: predicated region body
PF: predicated region fallthrough
CT: control target
= control target key end

     0   :  { %10 = vsyncpa [#allocation3], 0  ;;  %s2482_s0 = inlined_call_operand.vmem [shape: bf16[128,128], index: 0, kind: input, shape index: {}]   ;;  %s2483_s1 = inlined_call_operand.vmem [shape: bf16[128,512], index: 1, kind: input, shape index: {}]   ;;  %s2484_s2 = inlined_call_operand.vmem [shape: f32[1,512], index: 2, kind: input, shape index: {}]   ;;  %s2485_s3 = inlined_call_operand.vmem [shape: bf16[512,128], index: 3, kind: input, shape index: {}]   ;;  %s2486_s4 = inlined_call_operand.vmem [shape: f32[1,128], index: 4, kind: input, shape index: {}]   ;;  %s2487_s5 = inlined_call_operand.hbm [shape: f32[128,128], index: 5, kind: output, shape index: {}]  }
   0x1   :  { %12 = vsyncpa [#allocation3 + $0x1], 0  ;;  %s1865_s18 = smov 0   ;;  %s1867_s19 = smov 0  }
   0x2   :  { %s1869_s20 = smov 0   ;;  %s1871_s21 = smov 0  }
   0x3 LB: > { %s1886_s22 = sadd.s32 4294967295, %s1831_s21   ;;  %s1310_s23 = sadd.s32 4294967294, %s1831_s21   ;;  %s1831_s21 = sphi %s1871_s21, %s2493_s21   ;;  %s1827_s20 = sphi %s1869_s20, %s2492_s20   ;;  %s1823_s19 = sphi %s1867_s19, %s2491_s19   ;;  %s1819_s18 = sphi %s1865_s18, %s2490_s18  }
   0x4   : > { %s1890_s24 = sadd.s32 1, %s1831_s21   ;;  %s135_s25 = sadd.s32 1, %s1827_s20 }
   0x5   : > { %s132_s26 = ssub.s32 %s1831_s21, %s1890_s24  ;;  %p145_p0 = scmp.ne.s32.totalorder %s1827_s20, %s1823_s19 }
   0x6   : > { %p133_p1 = scmp.eq.s32.totalorder %s132_s26, 0  ;;  %p146_p2 = scmp.eq.s32.totalorder %s1886_s22, 1 }
   0x7   : > { %p151_p3 = scmp.ne.s32.totalorder %s1823_s19, %s1819_s18  ;;  %p152_p4 = scmp.eq.s32.totalorder %s1310_s23, 1 }
   0x8   : > { %s1901_s27 = scalar_select %p133_p1, %s1827_s20, %s135_s25  }
   0x9   : > { %p1903_p5 = por %p146_p2, %p145_p0  ;;  %p1907_p6 = por %p152_p4, %p151_p3 }
   0xa   : > { %p1313_p7 = scmp.ge.s32.totalorder %s1831_s21, 1  ;;  %p191_p8 = scmp.lt.s32.totalorder %s1831_s21, 3 }
   0xc   : > { %p192_p9 = pnand %p1313_p7, %p191_p8 }
   0xd   : > { %s1315_s17 = sshll.u32 (!%p192_p9), %s1886_s22, 3  ;;  %s216_s15 = sand.u32 (!%p192_p9), 1, %s1823_s19  }
   0xe   : > { %195 = sbr.rel (%p192_p9) target bundleno = 422 (0x1a6), region = 40  ;;  %p220_p10 = scmp.lt.s32.totalorder (!%p192_p9), %s1315_s17, 15 }
   0xf   : > { %s1314_s16 = sshll.u32 (!%p192_p9), %s216_s15, 6  ;;  %s1662_s25 = sshll.u32 (!%p192_p9), %s1886_s22, 6 }
  0x10   : > { %s2432_s23 = scalar_lea.vmem (!%p192_p9), [#allocation2], %s1314_s16  ;;  %s1244_s6 = scalar_lea.hbm (!%p192_p9), %s2487_s5, %s1662_s25 }
  0x11   : > { %s1247_s8 = sshll.u32 (!%p192_p9), %s1244_s6, 4  ;;  %s1233_s22 = scalar_lea.sflag (!%p192_p9), [#allocation3], %s216_s15  ;;  %s1248_s8 = int_to_ptr.hbm [resolvable:$true] %s1247_s8 }
  0x12   : > { %s1783_s9 = sshra.s32 (!%p192_p9), %s1248_s8, 4  ;;  %s1784_s9 = int_to_ptr.hbm [resolvable:$true] %s1783_s9 }
  0x13   : > { %v1447_v0 = vld [vmem:[%s2483_s1 + $0xe0] sm:$0xf]  ;;  %v1628_v1 = vld [vmem:[%s2483_s1 + $0xec] sm:$0xf0]  ;;  %v1626_v2 = vld [vmem:[%s2483_s1 + $0xe4] sm:$0xf]  ;;  %p1790_p0 = scmp.lt.s32.totalorder %s1784_s9, %s2487_s5 }
  0x14   : > { %v1448_v3 = vor.u32 %v1628_v1, %v1447_v0  ;;  %v1449_v4 = vld [vmem:[%s2483_s1 + $0xf0] sm:$0xf0]  ;;  %v1455_v5 = vld [vmem:[%s2483_s1 + $0xe8] sm:$0xf]  ;;  %v1629_v6 = vld [vmem:[%s2483_s1 + $0xf4] sm:$0xf0] }
  0x15   : > { %v1452_v7 = vor.u32 %v1626_v2, %v1449_v4  ;;  %v1456_v8 = vor.u32 %v1629_v6, %v1455_v5  ;;  %v1627_v9 = vld [vmem:[%s2483_s1 + $0xec] sm:$0xf]  ;;  %v1457_v10 = vld [vmem:[%s2483_s1 + $0xf8] sm:$0xf0]  ;;  %v1431_v11 = vld [vmem:[%s2483_s1 + $0xc0] sm:$0xf] }
  0x16   : > { %460 = vmatpush.bf16.msra.mxu0 %v1448_v3  ;;  %v1460_v12 = vor.u32 %v1627_v9, %v1457_v10  ;;  %v1624_v13 = vld [vmem:[%s2483_s1 + $0xcc] sm:$0xf0]  ;;  %v1622_v14 = vld [vmem:[%s2483_s1 + $0xc4] sm:$0xf]  ;;  %v1433_v15 = vld [vmem:[%s2483_s1 + $0xd0] sm:$0xf0] }
  0x17   : > { %489 = vmatpush.bf16.msra.mxu1 %v1452_v7  ;;  %518 = vmatpush.bf16.msra.mxu2 %v1456_v8  ;;  %v1432_v16 = vor.u32 %v1624_v13, %v1431_v11  ;;  %v1436_v17 = vor.u32 %v1622_v14, %v1433_v15  ;;  %v1439_v18 = vld [vmem:[%s2483_s1 + $0xc8] sm:$0xf]  ;;  %v1625_v19 = vld [vmem:[%s2483_s1 + $0xd4] sm:$0xf0]  ;;  %v1623_v20 = vld [vmem:[%s2483_s1 + $0xcc] sm:$0xf] }
  0x18   : > { %547 = vmatpush.bf16.msra.mxu3 %v1460_v12  ;;  %v1440_v21 = vor.u32 %v1625_v19, %v1439_v18  ;;  %v1441_v22 = vld [vmem:[%s2483_s1 + $0xd8] sm:$0xf0]  ;;  %v1415_v23 = vld [vmem:[%s2483_s1 + $0xa0] sm:$0xf]  ;;  %v1620_v24 = vld [vmem:[%s2483_s1 + $0xac] sm:$0xf0] }
  0x19   : > { %v1444_v25 = vor.u32 %v1623_v20, %v1441_v22  ;;  %v1618_v26 = vld [vmem:[%s2483_s1 + $0xa4] sm:$0xf]  ;;  %v1417_v27 = vld [vmem:[%s2483_s1 + $0xb0] sm:$0xf0]  ;;  %v1423_v28 = vld [vmem:[%s2483_s1 + $0xa8] sm:$0xf]  ;;  %v1416_v29 = vor.u32 %v1620_v24, %v1415_v23 }
  0x1a   : > { %461 = vmatpush.bf16.msra.mxu0 %v1432_v16  ;;  %v1621_v30 = vld [vmem:[%s2483_s1 + $0xb4] sm:$0xf0]  ;;  %v1619_v31 = vld [vmem:[%s2483_s1 + $0xac] sm:$0xf]  ;;  %v1425_v32 = vld [vmem:[%s2483_s1 + $0xb8] sm:$0xf0]  ;;  %v1420_v33 = vor.u32 %v1618_v26, %v1417_v27 }
  0x1b   : > { %490 = vmatpush.bf16.msra.mxu1 %v1436_v17  ;;  %519 = vmatpush.bf16.msra.mxu2 %v1440_v21  ;;  %v1424_v34 = vor.u32 %v1621_v30, %v1423_v28  ;;  %v1399_v35 = vld [vmem:[%s2483_s1 + $0x80] sm:$0xf]  ;;  %v1616_v36 = vld [vmem:[%s2483_s1 + $0x8c] sm:$0xf0]  ;;  %v1614_v37 = vld [vmem:[%s2483_s1 + $0x84] sm:$0xf]  ;;  %v1428_v38 = vor.u32 %v1619_v31, %v1425_v32 }
  0x1c   : > { %548 = vmatpush.bf16.msra.mxu3 %v1444_v25  ;;  %v1401_v39 = vld [vmem:[%s2483_s1 + $0x90] sm:$0xf0]  ;;  %v1407_v40 = vld [vmem:[%s2483_s1 + $0x88] sm:$0xf]  ;;  %v1617_v41 = vld [vmem:[%s2483_s1 + $0x94] sm:$0xf0]  ;;  %v1400_v44 = vor.u32 %v1616_v36, %v1399_v35 }
  0x1d   : > { %v1615_v42 = vld [vmem:[%s2483_s1 + $0x8c] sm:$0xf]  ;;  %v1409_v43 = vld [vmem:[%s2483_s1 + $0x98] sm:$0xf0]  ;;  %v1404_v45 = vor.u32 %v1614_v37, %v1401_v39  ;;  %v1408_v46 = vor.u32 %v1617_v41, %v1407_v40  ;;  %v1383_v47 = vld [vmem:[%s2483_s1 + $0x60] sm:$0xf] }
  0x1e   : > { %462 = vmatpush.bf16.msra.mxu0 %v1416_v29  ;;  %v1612_v48 = vld [vmem:[%s2483_s1 + $0x6c] sm:$0xf0]  ;;  %v1610_v49 = vld [vmem:[%s2483_s1 + $0x64] sm:$0xf]  ;;  %v1412_v50 = vor.u32 %v1615_v42, %v1409_v43  ;;  %v1385_v51 = vld [vmem:[%s2483_s1 + $0x70] sm:$0xf0] }
  0x1f   : > { %491 = vmatpush.bf16.msra.mxu1 %v1420_v33  ;;  %520 = vmatpush.bf16.msra.mxu2 %v1424_v34  ;;  %v1391_v52 = vld [vmem:[%s2483_s1 + $0x68] sm:$0xf]  ;;  %v1613_v53 = vld [vmem:[%s2483_s1 + $0x74] sm:$0xf0]  ;;  %v1611_v54 = vld [vmem:[%s2483_s1 + $0x6c] sm:$0xf]  ;;  %v1384_v56 = vor.u32 %v1612_v48, %v1383_v47  ;;  %v1388_v57 = vor.u32 %v1610_v49, %v1385_v51 }
  0x20   : > { %549 = vmatpush.bf16.msra.mxu3 %v1428_v38  ;;  %v1393_v55 = vld [vmem:[%s2483_s1 + $0x78] sm:$0xf0]  ;;  %v1392_v58 = vor.u32 %v1613_v53, %v1391_v52  ;;  %v1367_v59 = vld [vmem:[%s2483_s1 + $0x40] sm:$0xf]  ;;  %v1608_v60 = vld [vmem:[%s2483_s1 + $0x4c] sm:$0xf0] }
  0x21   : > { %v1606_v61 = vld [vmem:[%s2483_s1 + $0x44] sm:$0xf]  ;;  %v1396_v62 = vor.u32 %v1611_v54, %v1393_v55  ;;  %v1369_v63 = vld [vmem:[%s2483_s1 + $0x50] sm:$0xf0]  ;;  %v1375_v0 = vld [vmem:[%s2483_s1 + $0x48] sm:$0xf]  ;;  %v1368_v4 = vor.u32 %v1608_v60, %v1367_v59 }
  0x22   : > { %463 = vmatpush.bf16.msra.mxu0 %v1400_v44  ;;  %v1609_v1 = vld [vmem:[%s2483_s1 + $0x54] sm:$0xf0]  ;;  %v1607_v2 = vld [vmem:[%s2483_s1 + $0x4c] sm:$0xf]  ;;  %v1377_v3 = vld [vmem:[%s2483_s1 + $0x58] sm:$0xf0]  ;;  %v1372_v7 = vor.u32 %v1606_v61, %v1369_v63 }
  0x23   : > { %492 = vmatpush.bf16.msra.mxu1 %v1404_v45  ;;  %521 = vmatpush.bf16.msra.mxu2 %v1408_v46  ;;  %v1351_v5 = vld [vmem:[%s2483_s1 + $0x20] sm:$0xf]  ;;  %v1604_v6 = vld [vmem:[%s2483_s1 + $0x2c] sm:$0xf0]  ;;  %v1376_v8 = vor.u32 %v1609_v1, %v1375_v0  ;;  %v1602_v9 = vld [vmem:[%s2483_s1 + $0x24] sm:$0xf]  ;;  %v1380_v12 = vor.u32 %v1607_v2, %v1377_v3 }
  0x24   : > { %550 = vmatpush.bf16.msra.mxu3 %v1412_v50  ;;  %v1353_v10 = vld [vmem:[%s2483_s1 + $0x30] sm:$0xf0]  ;;  %v1359_v11 = vld [vmem:[%s2483_s1 + $0x28] sm:$0xf]  ;;  %v1605_v13 = vld [vmem:[%s2483_s1 + $0x34] sm:$0xf0]  ;;  %v1352_v16 = vor.u32 %v1604_v6, %v1351_v5 }
  0x25   : > { %v1603_v14 = vld [vmem:[%s2483_s1 + $0x2c] sm:$0xf]  ;;  %v1361_v15 = vld [vmem:[%s2483_s1 + $0x38] sm:$0xf0]  ;;  %v1335_v17 = vld [vmem:[%s2483_s1] sm:$0xf]  ;;  %v1356_v18 = vor.u32 %v1602_v9, %v1353_v10  ;;  %v1360_v19 = vor.u32 %v1605_v13, %v1359_v11 }
  0x26   : > { %464 = vmatpush.bf16.msra.mxu0 %v1384_v56  ;;  %v1600_v20 = vld [vmem:[%s2483_s1 + $0xc] sm:$0xf0]  ;;  %v1598_v21 = vld [vmem:[%s2483_s1 + $0x4] sm:$0xf]  ;;  %s2495_s17 = smov (!%p220_p10, %s1315_s17), 15  ;;  %v1364_v22 = vor.u32 %v1603_v14, %v1361_v15  ;;  %v1653_v34 = vld [vmem:[%s2485_s3 + $0xb8] sm:$0xff] }
  0x27   : > { %493 = vmatpush.bf16.msra.mxu1 %v1388_v57  ;;  %522 = vmatpush.bf16.msra.mxu2 %v1392_v58  ;;  %v1337_v23 = vld [vmem:[%s2483_s1 + $0x10] sm:$0xf0]  ;;  %v1343_v24 = vld [vmem:[%s2483_s1 + $0x8] sm:$0xf]  ;;  %v1601_v25 = vld [vmem:[%s2483_s1 + $0x14] sm:$0xf0]  ;;  %v1336_v28 = vor.u32 %v1600_v20, %v1335_v17 }
  0x28   : > { %551 = vmatpush.bf16.msra.mxu3 %v1396_v62  ;;  %v1599_v26 = vld [vmem:[%s2483_s1 + $0xc] sm:$0xf]  ;;  %v1345_v27 = vld [vmem:[%s2483_s1 + $0x18] sm:$0xf0]  ;;  %s1316_s7 = sshll.u32 %s2495_s17, 2  ;;  %v1340_v29 = vor.u32 %v1598_v21, %v1337_v23  ;;  %v1344_v30 = vor.u32 %v1601_v25, %v1343_v24  ;;  %v1652_v38 = vld [vmem:[%s2485_s3 + $0xb0] sm:$0xff] }
  0x29   : > { %s2109_s10 = scalar_lea.vmem %s2482_s0, %s1316_s7  ;;  %v1348_v31 = vor.u32 %v1599_v26, %v1345_v27  ;;  %v1637_v35 = vld [vmem:[%s2485_s3 + $0x38] sm:$0xff]  ;;  %v1636_v39 = vld [vmem:[%s2485_s3 + $0x30] sm:$0xff]  ;;  %v1651_v42 = vld [vmem:[%s2485_s3 + $0xa8] sm:$0xff]  ;;  %s1245_s7 = sshll.u32 %s2432_s23, 4  ;;  %s1246_s7 = int_to_ptr.vmem [resolvable:$true] %s1245_s7 }
  0x2a   : > { %465 = vmatpush.bf16.msra.mxu0 %v1368_v4  ;;  %v1594_v32 = vld [vmem:[%s2109_s10] sm:$0xff]  ;;  %v1595_v33 = vld [vmem:[%s2109_s10 + $0x8] sm:$0xff]  ;;  %v1661_v36 = vld [vmem:[%s2485_s3 + $0xf8] sm:$0xff]  ;;  %s1785_s17 = scalar_lea.hbm %s1784_s9, 64 }
  0x2b   : > { %494 = vmatpush.bf16.msra.mxu1 %v1372_v7  ;;  %523 = vmatpush.bf16.msra.mxu2 %v1376_v8  ;;  %v1645_v37 = vld [vmem:[%s2485_s3 + $0x78] sm:$0xff]  ;;  %v1660_v40 = vld [vmem:[%s2485_s3 + $0xf0] sm:$0xff]  ;;  %v1635_v43 = vld [vmem:[%s2485_s3 + $0x28] sm:$0xff]  ;;  %p1786_p11 = scmp.ne.s32.totalorder %s1784_s9, %s1785_s17 }
  0x2c   : > { %552 = vmatpush.bf16.msra.mxu3 %v1380_v12  ;;  %v1644_v41 = vld [vmem:[%s2485_s3 + $0x70] sm:$0xff]  ;;  %v1659_v44 = vld [vmem:[%s2485_s3 + $0xe8] sm:$0xff]  ;;  %v1650_v47 = vld [vmem:[%s2485_s3 + $0xa0] sm:$0xff] }
  0x2d   : > { %v1643_v45 = vld [vmem:[%s2485_s3 + $0x68] sm:$0xff]  ;;  %v1596_v46 = vld [vmem:[%s2109_s10 + $0x10] sm:$0xff]  ;;  %v1597_v48 = vld [vmem:[%s2109_s10 + $0x18] sm:$0xff]  ;;  %p1787_p12 = pnand %p1786_p11, %p1903_p5  ;;  %s1789_s10 = scalar_lea.hbm %s2487_s5, 128 }
  0x2e   : > { %466 = vmatpush.bf16.msra.mxu0 %v1352_v16  ;;  %v1634_v49 = vld [vmem:[%s2485_s3 + $0x20] sm:$0xff]  ;;  %v1633_v51 = vld [vmem:[%s2485_s3 + $0x18] sm:$0xff]  ;;  %v1632_v56 = vld [vmem:[%s2485_s3 + $0x10] sm:$0xff]  ;;  %p1791_p1 = scmp.lt.s32.totalorder %s1789_s10, %s1785_s17 }
  0x2f   : > { %495 = vmatpush.bf16.msra.mxu1 %v1356_v18  ;;  %524 = vmatpush.bf16.msra.mxu2 %v1360_v19  ;;  %v1642_v50 = vld [vmem:[%s2485_s3 + $0x60] sm:$0xff]  ;;  %v1641_v52 = vld [vmem:[%s2485_s3 + $0x58] sm:$0xff]  ;;  %v1640_v57 = vld [vmem:[%s2485_s3 + $0x50] sm:$0xff]  ;;  %p1788_p13 = pneg %p1787_p12 }
  0x30   : > { %553 = vmatpush.bf16.msra.mxu3 %v1364_v22  ;;  %v1658_v53 = vld [vmem:[%s2485_s3 + $0xe0] sm:$0xff]  ;;  %v1649_v54 = vld [vmem:[%s2485_s3 + $0x98] sm:$0xff]  ;;  %v1648_v59 = vld [vmem:[%s2485_s3 + $0x90] sm:$0xff]  ;;  %p1792_p2 = por %p1791_p1, %p1790_p0 }
  0x31   : > { %v1657_v55 = vld [vmem:[%s2485_s3 + $0xd8] sm:$0xff]  ;;  %v266_v58 = vld [vmem:[%s2484_s2] sm:$0xf]  ;;  %v1631_v60 = vld [vmem:[%s2485_s3 + $0x8] sm:$0xff] }
  0x32   : > { %467 = vmatpush.bf16.msra.mxu0 %v1336_v28  ;;  %v1639_v61 = vld [vmem:[%s2485_s3 + $0x48] sm:$0xff]  ;;  %v2193_v62 = vperm.slane %v266_v58, 0  ;;  %v1656_v63 = vld [vmem:[%s2485_s3 + $0xd0] sm:$0xff]  ;;  %v2198_v0 = vperm.slane %v266_v58, 1  ;;  %v1630_v2 = vld [vmem:[%s2485_s3] sm:$0xff]  ;;  %v2218_v11 = vperm.slane %v266_v58, 2  ;;  %p1793_p3 = pnand %p1792_p2, %p1788_p13 }
  0x33   : > { %496 = vmatpush.bf16.msra.mxu1 %v1340_v29  ;;  %525 = vmatpush.bf16.msra.mxu2 %v1344_v30  ;;  %v1638_v3 = vld [vmem:[%s2485_s3 + $0x40] sm:$0xff]  ;;  %v1647_v7 = vld [vmem:[%s2485_s3 + $0x88] sm:$0xff]  ;;  %v2220_v13 = vperm.slane %v266_v58, 3 }
  0x34   : > { %554 = vmatpush.bf16.msra.mxu3 %v1348_v31  ;;  %v1655_v8 = vld [vmem:[%s2485_s3 + $0xc8] sm:$0xff]  ;;  %v1646_v15 = vld [vmem:[%s2485_s3 + $0x80] sm:$0xff] }
  0x35   : > { %468 = vmatmul.bf16.vlgmr.msra.gmra.mxu0 %v1594_v32  ;;  %v1654_v30 = vld [vmem:[%s2485_s3 + $0xc0] sm:$0xff] }
  0x36   : > { %497 = vmatmul.bf16.vlgmr.msra.gmra.mxu1 %v1594_v32  ;;  %526 = vmatmul.bf16.vlgmr.msra.gmra.mxu2 %v1594_v32 }
  0x37   : > { %555 = vmatmul.bf16.vlgmr.msra.gmra.mxu3 %v1594_v32  ;;  %1166 = vmatpush.bf16.msrb.mxu2 %v1653_v34 }
  0x38   : > { %1108 = vmatpush.bf16.msrb.mxu0 %v1637_v35  ;;  %1195 = vmatpush.bf16.msrb.mxu3 %v1661_v36 }
  0x39   : > { %1137 = vmatpush.bf16.msrb.mxu1 %v1645_v37 }
  0x3b   : > { %1167 = vmatpush.bf16.msrb.mxu2 %v1652_v38 }
  0x3c   : > { %1109 = vmatpush.bf16.msrb.mxu0 %v1636_v39  ;;  %1196 = vmatpush.bf16.msrb.mxu3 %v1660_v40 }
  0x3d   : > { %1138 = vmatpush.bf16.msrb.mxu1 %v1644_v41 }
  0x3f   : > { %1168 = vmatpush.bf16.msrb.mxu2 %v1651_v42 }
  0x40   : > { %1110 = vmatpush.bf16.msrb.mxu0 %v1635_v43  ;;  %1197 = vmatpush.bf16.msrb.mxu3 %v1659_v44 }
  0x41   : > { %1139 = vmatpush.bf16.msrb.mxu1 %v1643_v45 }
  0x43   : > { %1169 = vmatpush.bf16.msrb.mxu2 %v1650_v47 }
  0x44   : > { %1111 = vmatpush.bf16.msrb.mxu0 %v1634_v49  ;;  %1198 = vmatpush.bf16.msrb.mxu3 %v1658_v53 }
  0x45   : > { %473 = vmatmul.bf16.gmra.mxu0 %v1595_v33  ;;  %1140 = vmatpush.bf16.msrb.mxu1 %v1642_v50 }
  0x46   : > { %502 = vmatmul.bf16.gmra.mxu1 %v1595_v33  ;;  %531 = vmatmul.bf16.gmra.mxu2 %v1595_v33 }
  0x47   : > { %560 = vmatmul.bf16.gmra.mxu3 %v1595_v33  ;;  %1170 = vmatpush.bf16.msrb.mxu2 %v1649_v54 }
  0x48   : > { %1112 = vmatpush.bf16.msrb.mxu0 %v1633_v51  ;;  %1199 = vmatpush.bf16.msrb.mxu3 %v1657_v55 }
  0x49   : > { %1141 = vmatpush.bf16.msrb.mxu1 %v1641_v52 }
  0x4b   : > { %1171 = vmatpush.bf16.msrb.mxu2 %v1648_v59 }
  0x4c   : > { %1113 = vmatpush.bf16.msrb.mxu0 %v1632_v56  ;;  %1200 = vmatpush.bf16.msrb.mxu3 %v1656_v63 }
  0x4d   : > { %1142 = vmatpush.bf16.msrb.mxu1 %v1640_v57 }
  0x4f   : > { %1172 = vmatpush.bf16.msrb.mxu2 %v1647_v7 }
  0x50   : > { %1114 = vmatpush.bf16.msrb.mxu0 %v1631_v60  ;;  %1201 = vmatpush.bf16.msrb.mxu3 %v1655_v8 }
  0x51   : > { %1143 = vmatpush.bf16.msrb.mxu1 %v1639_v61 }
  0x53   : > { %1173 = vmatpush.bf16.msrb.mxu2 %v1646_v15 }
  0x54   : > { %1115 = vmatpush.bf16.msrb.mxu0 %v1630_v2  ;;  %1202 = vmatpush.bf16.msrb.mxu3 %v1654_v30 }
  0x55   : > { %478 = vmatmul.bf16.gmra.mxu0 %v1596_v46  ;;  %1144 = vmatpush.bf16.msrb.mxu1 %v1638_v3 }
  0x56   : > { %507 = vmatmul.bf16.gmra.mxu1 %v1596_v46  ;;  %536 = vmatmul.bf16.gmra.mxu2 %v1596_v46 }
  0x57   : > { %565 = vmatmul.bf16.gmra.mxu3 %v1596_v46 }
  0x65   : > { %483 = vmatmul.bf16.gmra.mxu0 %v1597_v48 }
  0x66   : > { %512 = vmatmul.bf16.gmra.mxu1 %v1597_v48  ;;  %541 = vmatmul.bf16.gmra.mxu2 %v1597_v48 }
  0x67   : > { %570 = vmatmul.bf16.gmra.mxu3 %v1597_v48 }
  0xb2   : > { %v469_v1 = vpop.f32.mrf.mxu0 }
  0xb3   : > { %v2207_v4 = vadd.f32 %v469_v1, %v2193_v62  ;;  %v498_v5 = vpop.f32.mrf.mxu1 }
  0xb4   : > { %v499_v6 = vadd.f32 %v498_v5, %v2198_v0 }
  0xb5   : > { %v608_v9 = vmul.f32 %v2207_v4, %v2207_v4  ;;  %v576_v59 = vmul.f32 0.5, %v2207_v4 }
  0xb6   : > { %v609_v10 = vmul.f32 %v499_v6, %v499_v6  ;;  %v577_v60 = vmul.f32 0.5, %v499_v6 }
  0xb7   : > { %v640_v12 = vmul.f32 0.035677407, %v608_v9 }
  0xb8   : > { %v641_v14 = vmul.f32 0.035677407, %v609_v10 }
  0xb9   : > { %v527_v16 = vpop.f32.mrf.mxu2  ;;  %v672_v20 = vadd.f32 0.7978846, %v640_v12 }
  0xba   : > { %v528_v17 = vadd.f32 %v527_v16, %v2218_v11  ;;  %v556_v18 = vpop.f32.mrf.mxu3  ;;  %v471_v19 = vpop.f32.mrf.mxu0  ;;  %v673_v24 = vadd.f32 0.7978846, %v641_v14 }
  0xbb   : > { %v557_v21 = vadd.f32 %v556_v18, %v2220_v13  ;;  %v472_v22 = vadd.f32 %v471_v19, %v2193_v62  ;;  %v500_v23 = vpop.f32.mrf.mxu1  ;;  %v704_v31 = vmul.f32 %v672_v20, %v2207_v4 }
  0xbc   : > { %v610_v25 = vmul.f32 %v528_v17, %v528_v17  ;;  %v501_v26 = vadd.f32 %v500_v23, %v2198_v0  ;;  %v705_v34 = vmul.f32 %v673_v24, %v499_v6  ;;  %v2242_v3 = vmul.f32 0.5, %v528_v17 }
  0xbd   : > { %v611_v27 = vmul.f32 %v557_v21, %v557_v21  ;;  %v612_v29 = vmul.f32 %v472_v22, %v472_v22  ;;  %1705 = vtanh.f32 %v704_v31  ;;  %v2245_v10 = vmul.f32 0.5, %v557_v21 }
  0xbe   : > { %v642_v28 = vmul.f32 0.035677407, %v610_v25  ;;  %v613_v33 = vmul.f32 %v501_v26, %v501_v26  ;;  %1707 = vtanh.f32 %v705_v34  ;;  %v580_v12 = vmul.f32 0.5, %v472_v22 }
  0xbf   : > { %v643_v32 = vmul.f32 0.035677407, %v611_v27  ;;  %v644_v35 = vmul.f32 0.035677407, %v612_v29  ;;  %v581_v23 = vmul.f32 0.5, %v501_v26 }
  0xc0   : > { %v645_v36 = vmul.f32 0.035677407, %v613_v33  ;;  %v674_v38 = vadd.f32 0.7978846, %v642_v28 }
  0xc1   : > { %v529_v37 = vpop.f32.mrf.mxu2  ;;  %v676_v39 = vadd.f32 0.7978846, %v644_v35  ;;  %v675_v43 = vadd.f32 0.7978846, %v643_v32 }
  0xc2   : > { %v530_v40 = vadd.f32 %v529_v37, %v2218_v11  ;;  %v558_v41 = vpop.f32.mrf.mxu3  ;;  %v474_v42 = vpop.f32.mrf.mxu0  ;;  %v677_v48 = vadd.f32 0.7978846, %v645_v36  ;;  %v706_v50 = vmul.f32 %v674_v38, %v528_v17 }
  0xc3   : > { %v559_v44 = vadd.f32 %v558_v41, %v2220_v13  ;;  %v475_v45 = vadd.f32 %v474_v42, %v2193_v62  ;;  %v503_v46 = vpop.f32.mrf.mxu1  ;;  %v708_v47 = vmul.f32 %v676_v39, %v472_v22  ;;  %v707_v52 = vmul.f32 %v675_v43, %v557_v21  ;;  %v1706_v58 = vpop.eup %1705 }
  0xc4   : > { %v614_v49 = vmul.f32 %v530_v40, %v530_v40  ;;  %v2237_v55 = vadd.f32 %v503_v46, %v2198_v0  ;;  %v709_v56 = vmul.f32 %v677_v48, %v501_v26  ;;  %v1708_v2 = vpop.eup %1707  ;;  %v768_v19 = vadd.f32 1.0, %v1706_v58 }
  0xc5   : > { %1709 = vtanh.f32 %v708_v47  ;;  %v615_v51 = vmul.f32 %v559_v44, %v559_v44  ;;  %v616_v54 = vmul.f32 %v475_v45, %v475_v45  ;;  %v769_v17 = vadd.f32 1.0, %v1708_v2 }
  0xc6   : > { %v646_v53 = vmul.f32 0.035677407, %v614_v49  ;;  %v617_v63 = vmul.f32 %v2237_v55, %v2237_v55  ;;  %1711 = vtanh.f32 %v706_v50  ;;  %v2247_v24 = vmul.f32 0.5, %v530_v40 }
  0xc7   : > { %v647_v57 = vmul.f32 0.035677407, %v615_v51  ;;  %v648_v5 = vmul.f32 0.035677407, %v616_v54  ;;  %1713 = vtanh.f32 %v707_v52  ;;  %v2252_v28 = vmul.f32 0.5, %v559_v44 }
  0xc8   : > { %v678_v61 = vadd.f32 0.7978846, %v646_v53  ;;  %1715 = vtanh.f32 %v709_v56  ;;  %v649_v16 = vmul.f32 0.035677407, %v617_v63  ;;  %v2260_v35 = vmul.f32 0.5, %v475_v45 }
  0xc9   : > { %v532_v1 = vpop.f32.mrf.mxu2  ;;  %v679_v4 = vadd.f32 0.7978846, %v647_v57  ;;  %v680_v25 = vadd.f32 0.7978846, %v648_v5  ;;  %v800_v38 = vmul.f32 %v768_v19, %v576_v59  ;;  %v801_v39 = vmul.f32 %v769_v17, %v577_v60 }
  0xca   : > { %v533_v7 = vadd.f32 %v532_v1, %v2218_v11  ;;  %v561_v8 = vpop.f32.mrf.mxu3  ;;  %v476_v9 = vpop.f32.mrf.mxu0  ;;  %v710_v15 = vmul.f32 %v678_v61, %v530_v40  ;;  %v681_v32 = vadd.f32 0.7978846, %v649_v16  ;;  %v2269_v53 = vmul.f32 0.5, %v2237_v55 }
  0xcb   : > { %v505_v6 = vpop.f32.mrf.mxu1  ;;  %v1710_v14 = vpop.eup %1709  ;;  %v2250_v21 = vadd.f32 %v561_v8, %v2220_v13  ;;  %v711_v22 = vmul.f32 %v679_v4, %v559_v44  ;;  %v477_v29 = vadd.f32 %v476_v9, %v2193_v62  ;;  %v712_v41 = vmul.f32 %v680_v25, %v475_v45 }
  0xcc   : > { %v618_v18 = vmul.f32 %v533_v7, %v533_v7  ;;  %v772_v20 = vadd.f32 1.0, %v1710_v14  ;;  %v2256_v30 = vadd.f32 %v505_v6, %v2198_v0  ;;  %v1712_v31 = vpop.eup %1711  ;;  %1717 = vtanh.f32 %v710_v15 }
  0xcd   : > { %v619_v26 = vmul.f32 %v2250_v21, %v2250_v21  ;;  %v1714_v34 = vpop.eup %1713  ;;  %v620_v36 = vmul.f32 %v477_v29, %v477_v29  ;;  %1719 = vtanh.f32 %v711_v22  ;;  %v770_v52 = vadd.f32 1.0, %v1712_v31 }
  0xce   : > { %v650_v27 = vmul.f32 0.035677407, %v618_v18  ;;  %v804_v33 = vmul.f32 %v772_v20, %v580_v12  ;;  %v1716_v40 = vpop.eup %1715  ;;  %v621_v43 = vmul.f32 %v2256_v30, %v2256_v30  ;;  %v713_v45 = vmul.f32 %v681_v32, %v2237_v55 }
  0xcf   : > { %v652_v48 = vmul.f32 0.035677407, %v620_v36  ;;  %v651_v54 = vmul.f32 0.035677407, %v619_v26  ;;  %v771_v56 = vadd.f32 1.0, %v1714_v34  ;;  %v773_v57 = vadd.f32 1.0, %v1716_v40 }
  0xd0   : > { %v682_v42 = vadd.f32 0.7978846, %v650_v27  ;;  %v832_v51 = vpack.c.bf16 %v804_v33, %v800_v38  ;;  %v2275_v61 = vmul.f32 0.5, %v533_v7  ;;  %v653_v2 = vmul.f32 0.035677407, %v621_v43 }
  0xd1   : > { %v534_v37 = vpop.f32.mrf.mxu2  ;;  %v684_v1 = vadd.f32 0.7978846, %v652_v48  ;;  %1721 = vtanh.f32 %v712_v41  ;;  %v2278_v5 = vmul.f32 0.5, %v2250_v21  ;;  %v683_v9 = vadd.f32 0.7978846, %v651_v54 }
  0xd2   : > { %v535_v44 = vadd.f32 %v534_v37, %v2218_v11  ;;  %v563_v46 = vpop.f32.mrf.mxu3  ;;  %v479_v47 = vpop.f32.mrf.mxu0  ;;  %1116 = vmatmul.bf16.vlgmr.msrb.gmra.mxu0 %v832_v51  ;;  %v714_v63 = vmul.f32 %v682_v42, %v533_v7  ;;  %1723 = vtanh.f32 %v713_v45  ;;  %v2282_v12 = vmul.f32 0.5, %v477_v29 }
  0xd3   : > { %v2266_v49 = vadd.f32 %v563_v46, %v2220_v13  ;;  %v508_v50 = vpop.f32.mrf.mxu1  ;;  %v2273_v59 = vadd.f32 %v479_v47, %v2193_v62  ;;  %v1718_v60 = vpop.eup %1717  ;;  %v2288_v7 = vmul.f32 0.5, %v2256_v30  ;;  %v805_v16 = vmul.f32 %v773_v57, %v581_v23 }
  0xd4   : > { %v622_v58 = vmul.f32 %v535_v44, %v535_v44  ;;  %v2285_v4 = vadd.f32 %v508_v50, %v2198_v0  ;;  %v1720_v6 = vpop.eup %1719  ;;  %v774_v14 = vadd.f32 1.0, %v1718_v60  ;;  %1725 = vtanh.f32 %v714_v63 }
  0xd5   : > { %v623_v55 = vmul.f32 %v2266_v49, %v2266_v49  ;;  %v624_v15 = vmul.f32 %v2273_v59, %v2273_v59  ;;  %v716_v19 = vmul.f32 %v684_v1, %v477_v29  ;;  %v685_v17 = vadd.f32 0.7978846, %v653_v2 }
  0xd6   : > { %v654_v8 = vmul.f32 0.035677407, %v622_v58  ;;  %v625_v20 = vmul.f32 %v2285_v4, %v2285_v4  ;;  %v833_v32 = vpack.c.bf16 %v805_v16, %v801_v39  ;;  %v775_v34 = vadd.f32 1.0, %v1720_v6 }
  0xd7   : > { %v655_v31 = vmul.f32 0.035677407, %v623_v55  ;;  %v715_v36 = vmul.f32 %v683_v9, %v2250_v21  ;;  %v2298_v23 = vmul.f32 0.5, %v535_v44  ;;  %v1722_v37 = vpop.eup %1721  ;;  %v2304_v38 = vmul.f32 0.5, %v2266_v49 }
  0xd8   : > { %v686_v22 = vadd.f32 0.7978846, %v654_v8  ;;  %v2307_v40 = vmul.f32 0.5, %v2273_v59  ;;  %v656_v39 = vmul.f32 0.035677407, %v624_v15  ;;  %1145 = vmatmul.bf16.vlgmr.msrb.gmra.mxu1 %v833_v32  ;;  %v2311_v42 = vpop.eup %1723  ;;  %1727 = vtanh.f32 %v716_v19 }
  0xd9   : > { %v537_v18 = vpop.f32.mrf.mxu2  ;;  %v717_v21 = vmul.f32 %v685_v17, %v2256_v30  ;;  %v657_v43 = vmul.f32 0.035677407, %v625_v20  ;;  %v687_v48 = vadd.f32 0.7978846, %v655_v31  ;;  %v802_v50 = vmul.f32 %v770_v52, %v2242_v3 }
  0xda   : > { %v566_v25 = vpop.f32.mrf.mxu3  ;;  %v481_v27 = vpop.f32.mrf.mxu0  ;;  %v2295_v26 = vadd.f32 %v537_v18, %v2218_v11  ;;  %v718_v47 = vmul.f32 %v686_v22, %v535_v44  ;;  %v806_v51 = vmul.f32 %v774_v14, %v2247_v24  ;;  %v803_v57 = vmul.f32 %v771_v56, %v2245_v10 }
  0xdb   : > { %v510_v33 = vpop.f32.mrf.mxu1  ;;  %v2301_v29 = vadd.f32 %v566_v25, %v2220_v13  ;;  %v2318_v45 = vpop.eup %1725  ;;  %v807_v58 = vmul.f32 %v775_v34, %v2252_v28  ;;  %v482_v60 = vadd.f32 %v481_v27, %v2193_v62  ;;  %1729 = vtanh.f32 %v715_v36 }
  0xdc   : > { %v626_v41 = vmul.f32 %v2295_v26, %v2295_v26  ;;  %v688_v30 = vadd.f32 0.7978846, %v656_v39  ;;  %v834_v63 = vpack.c.bf16 %v806_v51, %v802_v50  ;;  %v511_v1 = vadd.f32 %v510_v33, %v2198_v0 }
  0xdd   : > { %v627_v46 = vmul.f32 %v2301_v29, %v2301_v29  ;;  %1731 = vtanh.f32 %v717_v21  ;;  %v689_v2 = vadd.f32 0.7978846, %v657_v43  ;;  %v835_v52 = vpack.c.bf16 %v807_v58, %v803_v57 }
  0xde   : > { %v658_v54 = vmul.f32 0.035677407, %v626_v41  ;;  %v719_v55 = vmul.f32 %v687_v48, %v2266_v49  ;;  %v2326_v10 = vmul.f32 0.5, %v2285_v4  ;;  %1174 = vmatmul.bf16.vlgmr.msrb.gmra.mxu2 %v834_v63  ;;  %v628_v28 = vmul.f32 %v482_v60, %v482_v60  ;;  %v1728_v6 = vpop.eup %1727 }
  0xdf   : > { %v659_v3 = vmul.f32 0.035677407, %v627_v46  ;;  %v629_v56 = vmul.f32 %v511_v1, %v511_v1  ;;  %1733 = vtanh.f32 %v718_v47  ;;  %1203 = vmatmul.bf16.vlgmr.msrb.gmra.mxu3 %v835_v52  ;;  %v720_v18 = vmul.f32 %v688_v30, %v2273_v59 }
  0xe0   : > { %v690_v14 = vadd.f32 0.7978846, %v658_v54  ;;  %v660_v19 = vmul.f32 0.035677407, %v628_v28  ;;  %v721_v20 = vmul.f32 %v689_v2, %v2285_v4  ;;  %1735 = vtanh.f32 %v719_v55 }
  0xe1   : > { %v539_v44 = vpop.f32.mrf.mxu2  ;;  %v661_v49 = vmul.f32 0.035677407, %v629_v56  ;;  %v691_v25 = vadd.f32 0.7978846, %v659_v3  ;;  %v1730_v31 = vpop.eup %1729  ;;  %v2341_v32 = vmul.f32 0.5, %v2295_v26  ;;  %v776_v33 = vadd.f32 1.0, %v1722_v37 }
  0xe2   : > { %v568_v24 = vpop.f32.mrf.mxu3  ;;  %v484_v8 = vpop.f32.mrf.mxu0  ;;  %v540_v15 = vadd.f32 %v539_v44, %v2218_v11  ;;  %v722_v36 = vmul.f32 %v690_v14, %v2295_v26  ;;  %v692_v39 = vadd.f32 0.7978846, %v660_v19  ;;  %1737 = vtanh.f32 %v720_v18 }
  0xe3   : > { %v513_v9 = vpop.f32.mrf.mxu1  ;;  %v2330_v16 = vadd.f32 %v568_v24, %v2220_v13  ;;  %v2334_v17 = vadd.f32 %v484_v8, %v2193_v62  ;;  %v1732_v34 = vpop.eup %1731  ;;  %v693_v41 = vadd.f32 0.7978846, %v661_v49  ;;  %v780_v46 = vadd.f32 1.0, %v1728_v6 }
  0xe4   : > { %v630_v27 = vmul.f32 %v540_v15, %v540_v15  ;;  %v2338_v22 = vadd.f32 %v513_v9, %v2198_v0  ;;  %1739 = vtanh.f32 %v721_v20  ;;  %v723_v50 = vmul.f32 %v691_v25, %v2301_v29 }
  0xe5   : > { %v631_v59 = vmul.f32 %v2330_v16, %v2330_v16  ;;  %v632_v43 = vmul.f32 %v2334_v17, %v2334_v17  ;;  %v1734_v48 = vpop.eup %1733  ;;  %v2349_v51 = vmul.f32 0.5, %v482_v60  ;;  %v2353_v26 = vmul.f32 0.5, %v511_v1 }
  0xe6   : > { %v662_v4 = vmul.f32 0.035677407, %v630_v27  ;;  %v633_v37 = vmul.f32 %v2338_v22, %v2338_v22  ;;  %v808_v54 = vmul.f32 %v776_v33, %v2260_v35  ;;  %v812_v57 = vmul.f32 %v780_v46, %v2282_v12  ;;  %v1736_v3 = vpop.eup %1735 }
  0xe7   : > { %v663_v21 = vmul.f32 0.035677407, %v631_v59  ;;  %v777_v58 = vadd.f32 1.0, %v2311_v42  ;;  %1741 = vtanh.f32 %v722_v36  ;;  %v724_v63 = vmul.f32 %v692_v39, %v482_v60 }
  0xe8   : > { %v725_v44 = vmul.f32 %v693_v41, %v511_v1  ;;  %v694_v2 = vadd.f32 0.7978846, %v662_v4  ;;  %v664_v24 = vmul.f32 0.035677407, %v632_v43  ;;  %v836_v8 = vpack.c.bf16 %v812_v57, %v808_v54  ;;  %v1738_v12 = vpop.eup %1737 }
  0xe9   : > { %v542_v47 = vpop.f32.mrf.mxu2  ;;  %v695_v52 = vadd.f32 0.7978846, %v663_v21  ;;  %v781_v55 = vadd.f32 1.0, %v1732_v34  ;;  %1743 = vtanh.f32 %v723_v50  ;;  %v2358_v28 = vmul.f32 0.5, %v540_v15 }
  0xea   : > { %v571_v30 = vpop.f32.mrf.mxu3  ;;  %v665_v56 = vmul.f32 0.035677407, %v633_v37  ;;  %v2361_v35 = vadd.f32 %v542_v47, %v2218_v11  ;;  %1121 = vmatmul.bf16.gmra.mxu0 %v836_v8  ;;  %v809_v42 = vmul.f32 %v777_v58, %v2269_v53  ;;  %v778_v9 = vadd.f32 1.0, %v2318_v45  ;;  %v1740_v6 = vpop.eup %1739 }
  0xeb   : > { %v813_v60 = vmul.f32 %v781_v55, %v2288_v7  ;;  %v2366_v1 = vadd.f32 %v571_v30, %v2220_v13  ;;  %1745 = vtanh.f32 %v724_v63  ;;  %v726_v14 = vmul.f32 %v694_v2, %v540_v15  ;;  %v486_v49 = vpop.f32.mrf.mxu0  ;;  %v515_v20 = vpop.f32.mrf.mxu1 }
  0xec   : > { %v634_v18 = vmul.f32 %v2361_v35, %v2361_v35  ;;  %v782_v19 = vadd.f32 1.0, %v1734_v48  ;;  %1747 = vtanh.f32 %v725_v44  ;;  %v727_v25 = vmul.f32 %v695_v52, %v2330_v16 }
  0xed   : > { %v696_v53 = vadd.f32 0.7978846, %v664_v24  ;;  %v837_v27 = vpack.c.bf16 %v813_v60, %v809_v42  ;;  %v1742_v59 = vpop.eup %1741  ;;  %v635_v33 = vmul.f32 %v2366_v1, %v2366_v1  ;;  %v810_v45 = vmul.f32 %v778_v9, %v2275_v61 }
  0xee   : > { %v814_v15 = vmul.f32 %v782_v19, %v2298_v23  ;;  %v779_v34 = vadd.f32 1.0, %v1730_v31  ;;  %v697_v36 = vadd.f32 0.7978846, %v665_v56  ;;  %v783_v39 = vadd.f32 1.0, %v1736_v3 }
  0xef   : > { %1150 = vmatmul.bf16.gmra.mxu1 %v837_v27  ;;  %v2377_v41 = vadd.f32 %v486_v49, %v2193_v62  ;;  %v2380_v4 = vadd.f32 %v515_v20, %v2198_v0  ;;  %v1744_v21 = vpop.eup %1743  ;;  %1749 = vtanh.f32 %v726_v14  ;;  %v666_v43 = vmul.f32 0.035677407, %v634_v18 }
  0xf0   : > { %v838_v46 = vpack.c.bf16 %v814_v15, %v810_v45  ;;  %v728_v61 = vmul.f32 %v696_v53, %v2334_v17  ;;  %v811_v23 = vmul.f32 %v779_v34, %v2278_v5  ;;  %v815_v31 = vmul.f32 %v783_v39, %v2304_v38 }
  0xf1   : > { %v544_v7 = vpop.f32.mrf.mxu2  ;;  %v636_v62 = vmul.f32 %v2377_v41, %v2377_v41  ;;  %v1746_v50 = vpop.eup %1745  ;;  %v599_v0 = vmul.f32 0.5, %v2330_v16  ;;  %1751 = vtanh.f32 %v727_v25  ;;  %v667_v37 = vmul.f32 0.035677407, %v635_v33 }
  0xf2   : > { %v2383_v47 = vadd.f32 %v544_v7, %v2218_v11  ;;  %v573_v48 = vpop.f32.mrf.mxu3  ;;  %1179 = vmatmul.bf16.gmra.mxu2 %v838_v46  ;;  %v637_v11 = vmul.f32 %v2380_v4, %v2380_v4  ;;  %v1748_v54 = vpop.eup %1747  ;;  %v729_v57 = vmul.f32 %v697_v36, %v2338_v22  ;;  %v839_v58 = vpack.c.bf16 %v815_v31, %v811_v23 }
  0xf3   : > { %v668_v5 = vmul.f32 0.035677407, %v636_v62  ;;  %v698_v30 = vadd.f32 0.7978846, %v666_v43  ;;  %v2397_v44 = vadd.f32 %v573_v48, %v2220_v13  ;;  %v784_v16 = vadd.f32 1.0, %v1738_v12 }
  0xf4   : > { %v638_v38 = vmul.f32 %v2383_v47, %v2383_v47  ;;  %v669_v63 = vmul.f32 0.035677407, %v637_v11  ;;  %1753 = vtanh.f32 %v728_v61  ;;  %1208 = vmatmul.bf16.gmra.mxu3 %v839_v58  ;;  %v788_v52 = vadd.f32 1.0, %v1746_v50 }
  0xf5   : > { %v700_v2 = vadd.f32 0.7978846, %v668_v5  ;;  %v1750_v24 = vpop.eup %1749  ;;  %v699_v8 = vadd.f32 0.7978846, %v667_v37  ;;  %v639_v56 = vmul.f32 %v2397_v44, %v2397_v44  ;;  %v816_v42 = vmul.f32 %v784_v16, %v2307_v40 }
  0xf6   : > { %v670_v3 = vmul.f32 0.035677407, %v638_v38  ;;  %v701_v55 = vadd.f32 0.7978846, %v669_v63  ;;  %v820_v13 = vmul.f32 %v788_v52, %v2349_v51  ;;  %v785_v14 = vadd.f32 1.0, %v1740_v6 }
  0xf7   : > { %v732_v60 = vmul.f32 %v700_v2, %v2377_v41  ;;  %v1752_v12 = vpop.eup %1751  ;;  %v671_v19 = vmul.f32 0.035677407, %v639_v56  ;;  %v789_v49 = vadd.f32 1.0, %v1748_v54  ;;  %v786_v20 = vadd.f32 1.0, %v1742_v59 }
  0xf8   : > { %v702_v9 = vadd.f32 0.7978846, %v670_v3  ;;  %v733_v18 = vmul.f32 %v701_v55, %v2380_v4  ;;  %v840_v53 = vpack.c.bf16 %v820_v13, %v816_v42  ;;  %v817_v27 = vmul.f32 %v785_v14, %v2326_v10 }
  0xf9   : > { %1755 = vtanh.f32 %v732_v60  ;;  %v703_v40 = vadd.f32 0.7978846, %v671_v19  ;;  %v821_v7 = vmul.f32 %v789_v49, %v2353_v26  ;;  %v790_v33 = vadd.f32 1.0, %v1750_v24 }
  0xfa   : > { %v734_v25 = vmul.f32 %v702_v9, %v2383_v47  ;;  %1757 = vtanh.f32 %v733_v18  ;;  %v1754_v45 = vpop.eup %1753  ;;  %v730_v51 = vmul.f32 %v698_v30, %v2361_v35  ;;  %1126 = vmatmul.bf16.gmra.mxu0 %v840_v53  ;;  %v787_v6 = vadd.f32 1.0, %v1744_v21 }
  0xfb   : > { %1759 = vtanh.f32 %v729_v57  ;;  %v791_v15 = vadd.f32 1.0, %v1752_v12  ;;  %v735_v59 = vmul.f32 %v703_v40, %v2397_v44  ;;  %v841_v34 = vpack.c.bf16 %v821_v7, %v817_v27 }
  0xfc   : > { %v818_v36 = vmul.f32 %v786_v20, %v2341_v32  ;;  %v822_v39 = vmul.f32 %v790_v33, %v2358_v28  ;;  %v595_v10 = vmul.f32 0.5, %v2301_v29  ;;  %1761 = vtanh.f32 %v734_v25 }
  0xfd   : > { %v823_v43 = vmul.f32 %v791_v15, %v599_v0  ;;  %v731_v26 = vmul.f32 %v699_v8, %v2366_v1  ;;  %1763 = vtanh.f32 %v730_v51  ;;  %v604_v48 = vmul.f32 0.5, %v2377_v41 }
  0xfe   : > { %v842_v46 = vpack.c.bf16 %v822_v39, %v818_v36  ;;  %v819_v23 = vmul.f32 %v787_v6, %v595_v10  ;;  %1765 = vtanh.f32 %v735_v59  ;;  %v792_v50 = vadd.f32 1.0, %v1754_v45 }
  0xff   : > { %v1756_v61 = vpop.eup %1755  ;;  %1155 = vmatmul.bf16.gmra.mxu1 %v841_v34  ;;  %1767 = vtanh.f32 %v731_v26  ;;  %v600_v28 = vmul.f32 0.5, %v2334_v17  ;;  %v605_v54 = vmul.f32 0.5, %v2380_v4  ;;  %v601_v30 = vmul.f32 0.5, %v2338_v22 }
 0x100   : > { %v1758_v21 = vpop.eup %1757  ;;  %v796_v31 = vadd.f32 1.0, %v1756_v61  ;;  %v843_v32 = vpack.c.bf16 %v823_v43, %v819_v23  ;;  %v606_v2 = vmul.f32 0.5, %v2383_v47  ;;  %v602_v24 = vmul.f32 0.5, %v2361_v35 }
 0x101   : > { %v1760_v62 = vpop.eup %1759  ;;  %v797_v37 = vadd.f32 1.0, %v1758_v21  ;;  %v824_v57 = vmul.f32 %v792_v50, %v600_v28  ;;  %v607_v4 = vmul.f32 0.5, %v2397_v44  ;;  %v603_v22 = vmul.f32 0.5, %v2366_v1  ;;  %v2425_v44 = vld [vmem:[%s2486_s4] ss:$0 sm:$0xff] }
 0x102   : > { %1184 = vmatmul.bf16.gmra.mxu2 %v842_v46  ;;  %v1762_v29 = vpop.eup %1761  ;;  %v828_v0 = vmul.f32 %v796_v31, %v604_v48  ;;  %v793_v58 = vadd.f32 1.0, %v1760_v62 }
 0x103   : > { %v1764_v11 = vpop.eup %1763  ;;  %v798_v38 = vadd.f32 1.0, %v1762_v29  ;;  %v829_v63 = vmul.f32 %v797_v37, %v605_v54 }
 0x104   : > { %1213 = vmatmul.bf16.gmra.mxu3 %v843_v32  ;;  %v1766_v5 = vpop.eup %1765  ;;  %v844_v41 = vpack.c.bf16 %v828_v0, %v824_v57  ;;  %v794_v3 = vadd.f32 1.0, %v1764_v11  ;;  %v825_v52 = vmul.f32 %v793_v58, %v601_v30 }
 0x105   : > { %v1768_v16 = vpop.eup %1767  ;;  %v799_v17 = vadd.f32 1.0, %v1766_v5  ;;  %v830_v8 = vmul.f32 %v798_v38, %v606_v2 }
 0x106   : > { %v845_v55 = vpack.c.bf16 %v829_v63, %v825_v52  ;;  %v795_v56 = vadd.f32 1.0, %v1768_v16  ;;  %v826_v42 = vmul.f32 %v794_v3, %v602_v24 }
 0x107   : > { %v831_v60 = vmul.f32 %v799_v17, %v607_v4 }
 0x108   : > { %v846_v9 = vpack.c.bf16 %v830_v8, %v826_v42  ;;  %v827_v47 = vmul.f32 %v795_v56, %v603_v22 }
 0x10a   : > { %1131 = vmatmul.bf16.gmra.mxu0 %v844_v41  ;;  %v847_v13 = vpack.c.bf16 %v831_v60, %v827_v47 }
 0x10f   : > { %1160 = vmatmul.bf16.gmra.mxu1 %v845_v55 }
 0x112   : > { %1189 = vmatmul.bf16.gmra.mxu2 %v846_v9 }
 0x114   : > { %1218 = vmatmul.bf16.gmra.mxu3 %v847_v13 }
 0x14f   : > { %v1117_v14 = vpop.f32.mrf.mxu0 }
 0x150   : > { %v1118_v12 = vadd.f32 %v2425_v44, %v1117_v14 }
 0x155   : > { %v1146_v35 = vpop.f32.mrf.mxu1 }
 0x156   : > { %v1147_v19 = vadd.f32 %v1146_v35, %v1118_v12 }
 0x157   : > { %v1119_v18 = vpop.f32.mrf.mxu0 }
 0x158   : > { %v1120_v53 = vadd.f32 %v2425_v44, %v1119_v18 }
 0x15d   : > { %v1148_v1 = vpop.f32.mrf.mxu1 }
 0x15e   : > { %v1149_v7 = vadd.f32 %v1148_v1, %v1120_v53 }
 0x161   : > { %v1175_v49 = vpop.f32.mrf.mxu2 }
 0x162   : > { %v1176_v20 = vadd.f32 %v1175_v49, %v1147_v19  ;;  %v1204_v25 = vpop.f32.mrf.mxu3 }
 0x164   : > { %v1205_v27 = vadd.f32 %v1204_v25, %v1176_v20 }
 0x166   : > { %1224 = vst [vmem:[%s2432_s23] sm:$0xff] %v1205_v27 }
 0x167   : > { %v1122_v40 = vpop.f32.mrf.mxu0 }
 0x168   : > { %v1123_v59 = vadd.f32 %v2425_v44, %v1122_v40 }
 0x169   : > { %v1177_v33 = vpop.f32.mrf.mxu2 }
 0x16a   : > { %v1178_v45 = vadd.f32 %v1177_v33, %v1149_v7  ;;  %v1206_v6 = vpop.f32.mrf.mxu3 }
 0x16c   : > { %v1151_v51 = vpop.f32.mrf.mxu1  ;;  %v1207_v15 = vadd.f32 %v1206_v6, %v1178_v45 }
 0x16d   : > { %v1152_v36 = vadd.f32 %v1151_v51, %v1123_v59 }
 0x16e   : > { %1225 = vst [vmem:[%s2432_s23 + $0x8] sm:$0xff] %v1207_v15 }
 0x16f   : > { %v1124_v34 = vpop.f32.mrf.mxu0 }
 0x170   : > { %v1125_v26 = vadd.f32 %v2425_v44, %v1124_v34 }
 0x174   : > { %v1153_v39 = vpop.f32.mrf.mxu1 }
 0x175   : > { %v1180_v10 = vpop.f32.mrf.mxu2  ;;  %v1154_v21 = vadd.f32 %v1153_v39, %v1125_v26 }
 0x176   : > { %v1181_v43 = vadd.f32 %v1180_v10, %v1152_v36 }
 0x177   : > { %v1209_v46 = vpop.f32.mrf.mxu3  ;;  %v1127_v61 = vpop.f32.mrf.mxu0 }
 0x178   : > { %v1210_v23 = vadd.f32 %v1209_v46, %v1181_v43  ;;  %v1128_v32 = vadd.f32 %v2425_v44, %v1127_v61 }
 0x17a   : > { %1226 = vst [vmem:[%s2432_s23 + $0x10] sm:$0xff] %v1210_v23 }
 0x17c   : > { %v1156_v31 = vpop.f32.mrf.mxu1 }
 0x17d   : > { %v1182_v62 = vpop.f32.mrf.mxu2  ;;  %v1157_v0 = vadd.f32 %v1156_v31, %v1128_v32 }
 0x17e   : > { %v1183_v48 = vadd.f32 %v1182_v62, %v1154_v21 }
 0x17f   : > { %v1211_v50 = vpop.f32.mrf.mxu3  ;;  %v1129_v28 = vpop.f32.mrf.mxu0 }
 0x180   : > { %v1212_v29 = vadd.f32 %v1211_v50, %v1183_v48  ;;  %v1130_v57 = vadd.f32 %v2425_v44, %v1129_v28 }
 0x182   : > { %1227 = vst [vmem:[%s2432_s23 + $0x18] sm:$0xff] %v1212_v29 }
 0x184   : > { %v1158_v54 = vpop.f32.mrf.mxu1 }
 0x185   : > { %v1185_v37 = vpop.f32.mrf.mxu2  ;;  %v1159_v30 = vadd.f32 %v1158_v54, %v1130_v57 }
 0x186   : > { %v1186_v11 = vadd.f32 %v1185_v37, %v1157_v0 }
 0x187   : > { %v1214_v58 = vpop.f32.mrf.mxu3  ;;  %v1132_v38 = vpop.f32.mrf.mxu0 }
 0x188   : > { %v1215_v5 = vadd.f32 %v1214_v58, %v1186_v11  ;;  %v1133_v16 = vadd.f32 %v2425_v44, %v1132_v38 }
 0x18a   : > { %1228 = vst [vmem:[%s2432_s23 + $0x20] sm:$0xff] %v1215_v5 }
 0x18c   : > { %v1161_v3 = vpop.f32.mrf.mxu1 }
 0x18d   : > { %v1187_v41 = vpop.f32.mrf.mxu2  ;;  %v1162_v17 = vadd.f32 %v1161_v3, %v1133_v16 }
 0x18e   : > { %v1188_v63 = vadd.f32 %v1187_v41, %v1159_v30 }
 0x18f   : > { %v1216_v2 = vpop.f32.mrf.mxu3  ;;  %v1134_v24 = vpop.f32.mrf.mxu0 }
 0x190   : > { %v1217_v52 = vadd.f32 %v1216_v2, %v1188_v63  ;;  %v1135_v55 = vadd.f32 %v2425_v44, %v1134_v24 }
 0x192   : > { %1229 = vst [vmem:[%s2432_s23 + $0x28] sm:$0xff] %v1217_v52 }
 0x194   : > { %v1163_v22 = vpop.f32.mrf.mxu1 }
 0x195   : > { %v1190_v8 = vpop.f32.mrf.mxu2  ;;  %v1164_v60 = vadd.f32 %v1163_v22, %v1135_v55 }
 0x196   : > { %v1191_v4 = vadd.f32 %v1190_v8, %v1162_v17 }
 0x197   : > { %v1219_v56 = vpop.f32.mrf.mxu3 }
 0x198   : > { %v1220_v42 = vadd.f32 %v1219_v56, %v1191_v4 }
 0x19a   : > { %1230 = vst [vmem:[%s2432_s23 + $0x30] sm:$0xff] %v1220_v42 }
 0x19d   : > { %v1192_v9 = vpop.f32.mrf.mxu2 }
 0x19e   : > { %v1193_v47 = vadd.f32 %v1192_v9, %v1164_v60 }
 0x19f   : > { %v1221_v13 = vpop.f32.mrf.mxu3 }
 0x1a0   : > { %v1222_v14 = vadd.f32 %v1221_v13, %v1193_v47 }
 0x1a2   : > { %1231 = vst [vmem:[%s2432_s23 + $0x38] sm:$0xff] %v1222_v14 }
 0x1a3   : > { %1796 = shalt.err (!%p1793_p3)
}
 0x1a4   : > { %s1833_s15 = smov 128   ;;  %s1834_s16 = smov 8  }
 0x1a5   : > { %1663 = dma.vmem_to_hbm [thread:$0]  (%p1903_p5), %s1246_s7, 1024, %s1248_s8, %s1233_s22, %s1833_s15, %s1833_s15, %s1834_s16  }
 0x1a6 PF: > { %p1669_p4 = scmp.ge.s32.totalorder %s1831_s21, 2  ;;  %s1262_s23 = sand.u32 1, %s1819_s18  }
 0x1a7   : > { %s1263_s25 = scalar_lea.sflag [#allocation3], %s1262_s23 }
 0x1a8   : > { %p1666_p7 = pnand %p1669_p4, %p1907_p6 }
 0x1aa   : > { %p1667_p8 = pneg %p1666_p7 }
 0x1ac   : > { %1814 = dma.done.wait (%p1667_p8), %s1263_s25, 1024  }
 0x1ad   : > { %1816 = vsyncadd (%p1667_p8), %s1263_s25, 4294966272  ;;  %p15_p9 = scmp.ge.s32.totalorder %s1890_s24, 4   ;;  %s2490_s18 = smov %s1823_s19 }
 0x1ae   : > { %s2491_s19 = smov %s1827_s20  ;;  %s2492_s20 = smov %s1901_s27 }
 0x1af   : > { %s2493_s21 = smov %s1890_s24  ;;  %17 = sbr.rel (!%p15_p9) target bundleno = 3 (0x3), region = 75 }
 0x1b4   :  { %1269 = vsyncpa [#allocation3], 1 }
 0x1b5   :  { %1271 = vsyncpa [#allocation3 + $0x1], 1 }

</bundles_post_ra>
